<compile_context>
chip_gen: v5e
topology: v5e:2x2
jax: 0.10.0
libtpu: 0.0.40
codegen_flags: <defaults>
</compile_context>

<pallas_src>
import functools
from math import factorial, sqrt

import numpy as np
import jax
import jax.numpy as jnp
from jax import lax
from jax.experimental import pallas as pl
from jax.experimental.pallas import tpu as pltpu


# pi used by cosine_cutoff in the reference: torch.acos(zeros(1)).item() * 2
_CUTOFF_PI = float(np.float32(np.arccos(np.float32(0.0)))) * 2.0
_PI_APPROX = 3.14159  # the literal used for the Ylm prefactor in the reference

_NSUB = 8
_NLANE = 128
_CHUNK = _NSUB * _NLANE  # atoms per grid chunk (one (8,128) tile per coord)


# ---------------------------------------------------------------------------
# hoisted power chain, faithful to the reference `powcmplx`
# (n == 2 special-cased exact square; n > 2 uses the quirky recurrence where
#  the updated real part feeds the imaginary-part update)
# ---------------------------------------------------------------------------
def _pow_chain(zr, zi, nmax):
    chain = [(jnp.ones_like(zr), jnp.zeros_like(zr))]          # n = 0
    if nmax >= 1:
        chain.append((zr, zi))                                  # n = 1
    if nmax >= 2:
        chain.append((zr * zr - zi * zi, 2.0 * zr * zi))        # n = 2 (exact)
    if nmax >= 3:
        r, im = zr, zi
        for n in range(2, nmax + 1):
            r = zr * r - zi * im
            im = zr * im + zi * r                               # uses updated r (ref quirk)
            if n >= 3:
                chain.append((r, im))                           # n = 3..nmax
    return chain


# ---------------------------------------------------------------------------
# Pallas kernel: grid = (batch, atom-chunk); one (8,128) atom tile per step
# ---------------------------------------------------------------------------
def _sht_kernel(pos_ref, out_ref, *, L, rcut):
    # pos_ref: (1, 1, 3, 8, 128) VMEM; out_ref: (1, 1, 128) VMEM (resident over chunks)
    k = pl.program_id(1)

    x = pos_ref[0, 0, 0]   # (8, 128)
    y = pos_ref[0, 0, 1]
    z = pos_ref[0, 0, 2]

    norm = jnp.sqrt(x * x + y * y + z * z)
    mask = norm > 0.0                                  # == `ids = norms > 0`
    safe_norm = jnp.where(mask, norm, 1.0)

    # cosine cutoff combined with the norms>0 mask (padded atoms drop out)
    cut = 0.5 * (jnp.cos(norm * (_CUTOFF_PI / rcut)) + 1.0)
    w = jnp.where(jnp.logical_and(mask, norm <= rcut), cut, 0.0)

    # hoisted: wl[l] = cut*mask / norm**l ; xw[l] = x0 * wl[l]
    # (the reference computes x0**s but never uses it; only x0 is applied)
    inv_norm = 1.0 / safe_norm
    wl = [w]
    for _ in range(L):
        wl.append(wl[-1] * inv_norm)
    xw = [z * wl[l] for l in range(L + 1)]

    # hoisted power chains
    pw1 = _pow_chain(-0.5 * x, -0.5 * y, L)
    pw2 = _pow_chain(0.5 * x, -0.5 * y, L)

    # (p, q) -> (zr, zi) cache, shared across every (l, m) coefficient
    zcache = {}

    def zpq(p, q):
        key = (p, q)
        if key not in zcache:
            z1r, z1i = pw1[p]
            z2r, z2i = pw2[q]
            zcache[key] = (z1r * z1r - z2i * z2i,              # reference quirk (kept)
                           z1r * z2i + z1i * z2r)
        return zcache[key]

    lane_ids = lax.broadcasted_iota(jnp.int32, (_NSUB, _NLANE), 1)
    acc = jnp.zeros((_NSUB, _NLANE), jnp.float32)

    def scatter(acc, contrib, idx):
        # per-sublane atom sums (lane reduce), scattered into lane `idx`
        col = jnp.sum(contrib, axis=1, keepdims=True)          # (8, 1)
        return jnp.where(lane_ids == idx, col, acc)

    for l in range(L + 1):
        for m in range(l, -1, -1):                             # M in range(-l, 1) -> m = l..0
            base = sqrt(float(factorial(l + m) * factorial(l - m)))
            base *= sqrt((2 * l + 1) / 4.0 / _PI_APPROX)
            if m > 0:
                base *= sqrt(2.0) * ((-1.0) ** m)
            sum_r = None
            sum_i = None
            for p in range(l + 1):
                q = p - m
                s = l - p - q
                if q < 0 or s < 0:
                    continue
                c = base / float(factorial(p) * factorial(q) * factorial(s))
                zr, zi = zpq(p, q)
                tr = zr * c
                sum_r = tr if sum_r is None else sum_r + tr
                if m > 0:
                    ti = zi * c
                    sum_i = ti if sum_i is None else sum_i + ti
            if sum_r is None:
                continue                                        # (never hit for m <= l)
            y_r = sum_r * xw[l]
            if m == 0:
                acc = scatter(acc, y_r, l * l + l)
            else:
                y_i = sum_i * xw[l]
                acc = scatter(acc, y_i, l * l + l - m)
                acc = scatter(acc, y_r, l * l + l + m)

    # sublane reduce -> lane-dense (1, 128) row; lanes >= (L+1)^2 stay 0
    row = jnp.sum(acc, axis=0, keepdims=True)

    @pl.when(k == 0)
    def _init():
        out_ref[0] = row

    @pl.when(k > 0)
    def _accumulate():
        out_ref[0] = out_ref[0] + row


# ---------------------------------------------------------------------------
# wrappers
# ---------------------------------------------------------------------------
def spherical_harmonic_transform_batched(pos_batched, L, rcut):
    """pos_batched: (B, N, 3). Returns (B, (L+1)^2) float32."""
    pos_batched = jnp.asarray(pos_batched, jnp.float32)
    B, N, _ = pos_batched.shape
    P = (L + 1) ** 2
    assert P <= _NLANE, "L too large for a single lane-dense output row"

    # pack into (B, C, 3, 8, 128): atoms over (chunk, sublane, lane), zero-padded.
    C = max(1, -(-N // _CHUNK))
    npad = C * _CHUNK
    slab = jnp.zeros((B, 3, npad), jnp.float32)
    slab = slab.at[:, :, :N].set(jnp.transpose(pos_batched, (0, 2, 1)))
    slab = slab.reshape(B, 3, C, _NSUB, _NLANE)
    slab = jnp.transpose(slab, (0, 2, 1, 3, 4))                 # (B, C, 3, 8, 128)

    kernel = functools.partial(_sht_kernel, L=int(L), rcut=float(rcut))
    out = pl.pallas_call(
        kernel,
        out_shape=jax.ShapeDtypeStruct((B, 1, _NLANE), jnp.float32),
        grid=(B, C),
        in_specs=[pl.BlockSpec((1, 1, 3, _NSUB, _NLANE),
                               lambda b, k: (b, k, 0, 0, 0))],
        out_specs=pl.BlockSpec((1, 1, _NLANE), lambda b, k: (b, 0, 0)),
        compiler_params=pltpu.CompilerParams(
            dimension_semantics=("parallel", "arbitrary")),
    )(slab)
    return out[:, 0, :P]                                        # (B, P)


def spherical_harmonic_transform(pos, L, rcut):
    """pos: (N, 3). Returns ((L+1)^2, 1) float32, matching the PyTorch forward."""
    pos = jnp.asarray(pos, jnp.float32)
    clms = spherical_harmonic_transform_batched(pos[None], L, rcut)[0]
    return clms.reshape(-1, 1)


# ---------------------------------------------------------------------------
# pure-numpy reference (mirrors the PyTorch forward exactly, incl. its quirks)
# ---------------------------------------------------------------------------
def _ref_forward(pos, L, rcut):
    pos = np.asarray(pos, np.float64)
    clms = np.zeros(((L + 1) ** 2, 1), np.float64)
    norms = np.linalg.norm(pos, axis=1)
    ids = norms > 0
    xr, yr, zr = pos[ids, 0], pos[ids, 1], pos[ids, 2]
    xpl1r, xpl1i = -0.5 * xr, -0.5 * yr
    xm1r, xm1i = 0.5 * xr, -0.5 * yr
    x0 = zr
    n = norms[ids]
    cut = 0.5 * (np.cos(n * (_CUTOFF_PI / rcut)) + 1.0)
    cut[n > rcut] = 0.0

    def powc(a, b, k):
        if k == 0:
            return np.ones_like(a), np.zeros_like(a)
        if k == 1:
            return a, b
        if k == 2:
            return a * a - b * b, 2 * a * b
        r, im = a.copy(), b.copy()
        for _ in range(2, k + 1):
            r = a * r - b * im
            im = a * im + b * r
        return r, im

    i = 0
    for l in range(L + 1):
        for M in range(-l, 1):
            m = abs(M)
            shr = np.zeros_like(xpl1r)
            shi = np.zeros_like(xpl1i)
            for p in range(l + 1):
                q = p - m
                s = l - p - q
                if q >= 0 and s >= 0:
                    z1r, z1i = powc(xpl1r, xpl1i, p)
                    z2r, z2i = powc(xm1r, xm1i, q)
                    zre = z1r ** 2 - z2i ** 2
                    zim = z1r * z2i + z1i * z2r
                    c = factorial(p) * factorial(q) * factorial(s)
                    shr = shr + zre * x0 / c
                    shi = shi + zim * x0 / c
            pref = sqrt(factorial(l + m) * factorial(l - m))
            shr, shi = shr * pref, shi * pref
            shr, shi = shr / n ** l, shi / n ** l
            shr, shi = shr * cut, shi * cut
            scl = sqrt((2 * l + 1) / 4.0 / _PI_APPROX)
            cr, ci = np.sum(shr * scl), np.sum(shi * scl)
            if m == 0:
                clms[i] = cr
            else:
                fac = sqrt(2) * (-1) ** m
                clms[i] = fac * ci
                clms[i + 2 * m] = fac * cr
            i += 1
        i += l
    return clms


if __name__ == "__main__":
    L = 2
    rcut = 3.0
    N = 16

    key = jax.random.PRNGKey(0)
    pos = jax.random.normal(key, (N, 3), dtype=jnp.float32) * 1.5
    # include one zero-norm row to exercise the `norms > 0` filtering path
    pos = pos.at[3].set(jnp.zeros(3, jnp.float32))

    clms = jax.block_until_ready(spherical_harmonic_transform(pos, L, rcut))
    ref = _ref_forward(np.asarray(pos), L, rcut)
    np.testing.assert_allclose(np.asarray(clms), ref, rtol=1e-3, atol=1e-4)

    # batched + multi-chunk path: 2 systems x 1040 atoms -> grid (2, 2),
    # batch "parallel" (both TCs on v7x), chunk "arbitrary" with output
    # accumulation resident in VMEM.
    key2 = jax.random.PRNGKey(1)
    Nb = 1040
    pos_b = jax.random.normal(key2, (2, Nb, 3), dtype=jnp.float32) * 1.5
    clms_b = jax.block_until_ready(
        spherical_harmonic_transform_batched(pos_b, L, rcut))
    for b in range(2):
        ref_b = _ref_forward(np.asarray(pos_b[b]), L, rcut)
        np.testing.assert_allclose(
            np.asarray(clms_b[b]).reshape(-1, 1), ref_b, rtol=1e-3, atol=1e-3)

    print("KERNEL_OK")
</pallas_src>

<mosaic_0001>
module attributes {stable_mosaic.version = 11 : i64} {
  func.func @_sht_kernel(%arg0: i32, %arg1: i32, %arg2: memref<1x1x3x8x128xf32, #tpu.memory_space<vmem>>, %arg3: memref<1x1x128xf32, #tpu.memory_space<vmem>>) attributes {dimension_semantics = [#tpu.dimension_semantics<parallel>, #tpu.dimension_semantics<arbitrary>], iteration_bounds = array<i64: 1, 1>, scalar_prefetch = 0 : i64, scratch_operands = 0 : i64, tpu.core_type = #tpu.core_type<tc>, window_params = [{transform_indices = @transform_0, window_bounds = array<i64: 1, 1, 3, 8, 128>}, {transform_indices = @transform_1, window_bounds = array<i64: 1, 1, 128>}]} {
    %c0 = arith.constant 0 : index
    %c0_0 = arith.constant 0 : index
    %c0_1 = arith.constant 0 : index
    %c0_2 = arith.constant 0 : index
    %c0_3 = arith.constant 0 : index
    %0 = vector.load %arg2[%c0, %c0_0, %c0_1, %c0_2, %c0_3] : memref<1x1x3x8x128xf32, #tpu.memory_space<vmem>>, vector<1x1x1x8x128xf32>
    %1 = vector.shape_cast %0 : vector<1x1x1x8x128xf32> to vector<8x128xf32>
    %c0_4 = arith.constant 0 : index
    %c0_5 = arith.constant 0 : index
    %c1 = arith.constant 1 : index
    %c0_6 = arith.constant 0 : index
    %c0_7 = arith.constant 0 : index
    %2 = vector.load %arg2[%c0_4, %c0_5, %c1, %c0_6, %c0_7] : memref<1x1x3x8x128xf32, #tpu.memory_space<vmem>>, vector<1x1x1x8x128xf32>
    %3 = vector.shape_cast %2 : vector<1x1x1x8x128xf32> to vector<8x128xf32>
    %c0_8 = arith.constant 0 : index
    %c0_9 = arith.constant 0 : index
    %c2 = arith.constant 2 : index
    %c0_10 = arith.constant 0 : index
    %c0_11 = arith.constant 0 : index
    %4 = vector.load %arg2[%c0_8, %c0_9, %c2, %c0_10, %c0_11] : memref<1x1x3x8x128xf32, #tpu.memory_space<vmem>>, vector<1x1x1x8x128xf32>
    %5 = vector.shape_cast %4 : vector<1x1x1x8x128xf32> to vector<8x128xf32>
    %6 = arith.mulf %1, %1 : vector<8x128xf32>
    %7 = arith.mulf %3, %3 : vector<8x128xf32>
    %8 = arith.addf %6, %7 : vector<8x128xf32>
    %9 = arith.mulf %5, %5 : vector<8x128xf32>
    %10 = arith.addf %8, %9 : vector<8x128xf32>
    %11 = math.sqrt %10 : vector<8x128xf32>
    %cst = arith.constant 0.000000e+00 : f32
    %12 = vector.broadcast %cst : f32 to vector<8x128xf32>
    %13 = arith.cmpf ogt, %11, %12 : vector<8x128xf32>
    %cst_12 = arith.constant 1.000000e+00 : f32
    %14 = vector.broadcast %cst_12 : f32 to vector<8x128xf32>
    %15 = arith.select %13, %11, %14 : vector<8x128xi1>, vector<8x128xf32>
    %cst_13 = arith.constant 1.04719758 : f32
    %16 = vector.broadcast %cst_13 : f32 to vector<8x128xf32>
    %17 = arith.mulf %11, %16 : vector<8x128xf32>
    %18 = math.cos %17 : vector<8x128xf32>
    %cst_14 = arith.constant 1.000000e+00 : f32
    %19 = vector.broadcast %cst_14 : f32 to vector<8x128xf32>
    %20 = arith.addf %18, %19 : vector<8x128xf32>
    %cst_15 = arith.constant 5.000000e-01 : f32
    %21 = vector.broadcast %cst_15 : f32 to vector<8x128xf32>
    %22 = arith.mulf %21, %20 : vector<8x128xf32>
    %cst_16 = arith.constant 3.000000e+00 : f32
    %23 = vector.broadcast %cst_16 : f32 to vector<8x128xf32>
    %24 = arith.cmpf ole, %11, %23 : vector<8x128xf32>
    %25 = arith.andi %13, %24 : vector<8x128xi1>
    %cst_17 = arith.constant 0.000000e+00 : f32
    %26 = vector.broadcast %cst_17 : f32 to vector<8x128xf32>
    %27 = arith.select %25, %22, %26 : vector<8x128xi1>, vector<8x128xf32>
    %cst_18 = arith.constant 1.000000e+00 : f32
    %28 = vector.broadcast %cst_18 : f32 to vector<8x128xf32>
    %29 = arith.divf %28, %15 : vector<8x128xf32>
    %30 = arith.mulf %27, %29 : vector<8x128xf32>
    %31 = arith.mulf %30, %29 : vector<8x128xf32>
    %32 = arith.mulf %5, %27 : vector<8x128xf32>
    %33 = arith.mulf %5, %30 : vector<8x128xf32>
    %34 = arith.mulf %5, %31 : vector<8x128xf32>
    %cst_19 = arith.constant -5.000000e-01 : f32
    %35 = vector.broadcast %cst_19 : f32 to vector<8x128xf32>
    %36 = arith.mulf %35, %1 : vector<8x128xf32>
    %cst_20 = arith.constant -5.000000e-01 : f32
    %37 = vector.broadcast %cst_20 : f32 to vector<8x128xf32>
    %38 = arith.mulf %37, %3 : vector<8x128xf32>
    %cst_21 = arith.constant 1.000000e+00 : f32
    %39 = vector.broadcast %cst_21 : f32 to vector<8x128xf32>
    %40 = arith.mulf %36, %36 : vector<8x128xf32>
    %41 = arith.mulf %38, %38 : vector<8x128xf32>
    %42 = arith.subf %40, %41 : vector<8x128xf32>
    %cst_22 = arith.constant 2.000000e+00 : f32
    %43 = vector.broadcast %cst_22 : f32 to vector<8x128xf32>
    %44 = arith.mulf %43, %36 : vector<8x128xf32>
    %45 = arith.mulf %44, %38 : vector<8x128xf32>
    %cst_23 = arith.constant -5.000000e-01 : f32
    %46 = vector.broadcast %cst_23 : f32 to vector<8x128xf32>
    %47 = arith.mulf %46, %3 : vector<8x128xf32>
    %cst_24 = arith.constant 1.000000e+00 : f32
    %48 = vector.broadcast %cst_24 : f32 to vector<8x128xf32>
    %cst_25 = arith.constant 0.000000e+00 : f32
    %49 = vector.broadcast %cst_25 : f32 to vector<8x128xf32>
    %50 = tpu.iota {dimensions = array<i32: 1>} : vector<8x128xi32>
    %cst_26 = arith.constant 0.000000e+00 : f32
    %51 = vector.broadcast %cst_26 : f32 to vector<8x128xf32>
    %52 = arith.mulf %39, %39 : vector<8x128xf32>
    %53 = arith.mulf %49, %49 : vector<8x128xf32>
    %54 = arith.subf %52, %53 : vector<8x128xf32>
    %cst_27 = arith.constant 0.282094926 : f32
    %55 = vector.broadcast %cst_27 : f32 to vector<8x128xf32>
    %56 = arith.mulf %54, %55 : vector<8x128xf32>
    %57 = arith.mulf %56, %32 : vector<8x128xf32>
    %cst_28 = arith.constant dense<0.000000e+00> : vector<8xf32>
    %58 = vector.multi_reduction <add>, %57, %cst_28 [1] : vector<8x128xf32> to vector<8xf32>
    %59 = vector.shape_cast %58 : vector<8xf32> to vector<8x1xf32>
    %c0_i32 = arith.constant 0 : i32
    %60 = vector.broadcast %c0_i32 : i32 to vector<8x128xi32>
    %61 = arith.cmpi eq, %50, %60 : vector<8x128xi32>
    %62 = vector.shape_cast %59 : vector<8x1xf32> to vector<8x1xf32>
    %63 = vector.broadcast %62 : vector<8x1xf32> to vector<8x128xf32>
    %64 = arith.select %61, %63, %51 : vector<8x128xi1>, vector<8x128xf32>
    %65 = arith.mulf %36, %36 : vector<8x128xf32>
    %66 = arith.mulf %49, %49 : vector<8x128xf32>
    %67 = arith.subf %65, %66 : vector<8x128xf32>
    %68 = arith.mulf %36, %49 : vector<8x128xf32>
    %69 = arith.mulf %38, %48 : vector<8x128xf32>
    %70 = arith.addf %68, %69 : vector<8x128xf32>
    %cst_29 = arith.constant -0.977205455 : f32
    %71 = vector.broadcast %cst_29 : f32 to vector<8x128xf32>
    %72 = arith.mulf %67, %71 : vector<8x128xf32>
    %cst_30 = arith.constant -0.977205455 : f32
    %73 = vector.broadcast %cst_30 : f32 to vector<8x128xf32>
    %74 = arith.mulf %70, %73 : vector<8x128xf32>
    %75 = arith.mulf %72, %33 : vector<8x128xf32>
    %76 = arith.mulf %74, %33 : vector<8x128xf32>
    %cst_31 = arith.constant dense<0.000000e+00> : vector<8xf32>
    %77 = vector.multi_reduction <add>, %76, %cst_31 [1] : vector<8x128xf32> to vector<8xf32>
    %78 = vector.shape_cast %77 : vector<8xf32> to vector<8x1xf32>
    %c1_i32 = arith.constant 1 : i32
    %79 = vector.broadcast %c1_i32 : i32 to vector<8x128xi32>
    %80 = arith.cmpi eq, %50, %79 : vector<8x128xi32>
    %81 = vector.shape_cast %78 : vector<8x1xf32> to vector<8x1xf32>
    %82 = vector.broadcast %81 : vector<8x1xf32> to vector<8x128xf32>
    %83 = arith.select %80, %82, %64 : vector<8x128xi1>, vector<8x128xf32>
    %cst_32 = arith.constant dense<0.000000e+00> : vector<8xf32>
    %84 = vector.multi_reduction <add>, %75, %cst_32 [1] : vector<8x128xf32> to vector<8xf32>
    %85 = vector.shape_cast %84 : vector<8xf32> to vector<8x1xf32>
    %c3_i32 = arith.constant 3 : i32
    %86 = vector.broadcast %c3_i32 : i32 to vector<8x128xi32>
    %87 = arith.cmpi eq, %50, %86 : vector<8x128xi32>
    %88 = vector.shape_cast %85 : vector<8x1xf32> to vector<8x1xf32>
    %89 = vector.broadcast %88 : vector<8x1xf32> to vector<8x128xf32>
    %90 = arith.select %87, %89, %83 : vector<8x128xi1>, vector<8x128xf32>
    %cst_33 = arith.constant 0.488602728 : f32
    %91 = vector.broadcast %cst_33 : f32 to vector<8x128xf32>
    %92 = arith.mulf %54, %91 : vector<8x128xf32>
    %93 = arith.mulf %92, %33 : vector<8x128xf32>
    %cst_34 = arith.constant dense<0.000000e+00> : vector<8xf32>
    %94 = vector.multi_reduction <add>, %93, %cst_34 [1] : vector<8x128xf32> to vector<8xf32>
    %95 = vector.shape_cast %94 : vector<8xf32> to vector<8x1xf32>
    %c2_i32 = arith.constant 2 : i32
    %96 = vector.broadcast %c2_i32 : i32 to vector<8x128xi32>
    %97 = arith.cmpi eq, %50, %96 : vector<8x128xi32>
    %98 = vector.shape_cast %95 : vector<8x1xf32> to vector<8x1xf32>
    %99 = vector.broadcast %98 : vector<8x1xf32> to vector<8x128xf32>
    %100 = arith.select %97, %99, %90 : vector<8x128xi1>, vector<8x128xf32>
    %101 = arith.mulf %42, %42 : vector<8x128xf32>
    %102 = arith.mulf %49, %49 : vector<8x128xf32>
    %103 = arith.subf %101, %102 : vector<8x128xf32>
    %104 = arith.mulf %42, %49 : vector<8x128xf32>
    %105 = arith.mulf %45, %48 : vector<8x128xf32>
    %106 = arith.addf %104, %105 : vector<8x128xf32>
    %cst_35 = arith.constant 2.18509769 : f32
    %107 = vector.broadcast %cst_35 : f32 to vector<8x128xf32>
    %108 = arith.mulf %103, %107 : vector<8x128xf32>
    %cst_36 = arith.constant 2.18509769 : f32
    %109 = vector.broadcast %cst_36 : f32 to vector<8x128xf32>
    %110 = arith.mulf %106, %109 : vector<8x128xf32>
    %111 = arith.mulf %108, %34 : vector<8x128xf32>
    %112 = arith.mulf %110, %34 : vector<8x128xf32>
    %cst_37 = arith.constant dense<0.000000e+00> : vector<8xf32>
    %113 = vector.multi_reduction <add>, %112, %cst_37 [1] : vector<8x128xf32> to vector<8xf32>
    %114 = vector.shape_cast %113 : vector<8xf32> to vector<8x1xf32>
    %c4_i32 = arith.constant 4 : i32
    %115 = vector.broadcast %c4_i32 : i32 to vector<8x128xi32>
    %116 = arith.cmpi eq, %50, %115 : vector<8x128xi32>
    %117 = vector.shape_cast %114 : vector<8x1xf32> to vector<8x1xf32>
    %118 = vector.broadcast %117 : vector<8x1xf32> to vector<8x128xf32>
    %119 = arith.select %116, %118, %100 : vector<8x128xi1>, vector<8x128xf32>
    %cst_38 = arith.constant dense<0.000000e+00> : vector<8xf32>
    %120 = vector.multi_reduction <add>, %111, %cst_38 [1] : vector<8x128xf32> to vector<8xf32>
    %121 = vector.shape_cast %120 : vector<8xf32> to vector<8x1xf32>
    %c8_i32 = arith.constant 8 : i32
    %122 = vector.broadcast %c8_i32 : i32 to vector<8x128xi32>
    %123 = arith.cmpi eq, %50, %122 : vector<8x128xi32>
    %124 = vector.shape_cast %121 : vector<8x1xf32> to vector<8x1xf32>
    %125 = vector.broadcast %124 : vector<8x1xf32> to vector<8x128xf32>
    %126 = arith.select %123, %125, %119 : vector<8x128xi1>, vector<8x128xf32>
    %cst_39 = arith.constant -2.18509769 : f32
    %127 = vector.broadcast %cst_39 : f32 to vector<8x128xf32>
    %128 = arith.mulf %67, %127 : vector<8x128xf32>
    %cst_40 = arith.constant -2.18509769 : f32
    %129 = vector.broadcast %cst_40 : f32 to vector<8x128xf32>
    %130 = arith.mulf %70, %129 : vector<8x128xf32>
    %131 = arith.mulf %128, %34 : vector<8x128xf32>
    %132 = arith.mulf %130, %34 : vector<8x128xf32>
    %cst_41 = arith.constant dense<0.000000e+00> : vector<8xf32>
    %133 = vector.multi_reduction <add>, %132, %cst_41 [1] : vector<8x128xf32> to vector<8xf32>
    %134 = vector.shape_cast %133 : vector<8xf32> to vector<8x1xf32>
    %c5_i32 = arith.constant 5 : i32
    %135 = vector.broadcast %c5_i32 : i32 to vector<8x128xi32>
    %136 = arith.cmpi eq, %50, %135 : vector<8x128xi32>
    %137 = vector.shape_cast %134 : vector<8x1xf32> to vector<8x1xf32>
    %138 = vector.broadcast %137 : vector<8x1xf32> to vector<8x128xf32>
    %139 = arith.select %136, %138, %126 : vector<8x128xi1>, vector<8x128xf32>
    %cst_42 = arith.constant dense<0.000000e+00> : vector<8xf32>
    %140 = vector.multi_reduction <add>, %131, %cst_42 [1] : vector<8x128xf32> to vector<8xf32>
    %141 = vector.shape_cast %140 : vector<8xf32> to vector<8x1xf32>
    %c7_i32 = arith.constant 7 : i32
    %142 = vector.broadcast %c7_i32 : i32 to vector<8x128xi32>
    %143 = arith.cmpi eq, %50, %142 : vector<8x128xi32>
    %144 = vector.shape_cast %141 : vector<8x1xf32> to vector<8x1xf32>
    %145 = vector.broadcast %144 : vector<8x1xf32> to vector<8x128xf32>
    %146 = arith.select %143, %145, %139 : vector<8x128xi1>, vector<8x128xf32>
    %cst_43 = arith.constant 0.630783379 : f32
    %147 = vector.broadcast %cst_43 : f32 to vector<8x128xf32>
    %148 = arith.mulf %54, %147 : vector<8x128xf32>
    %149 = arith.mulf %36, %36 : vector<8x128xf32>
    %150 = arith.mulf %47, %47 : vector<8x128xf32>
    %151 = arith.subf %149, %150 : vector<8x128xf32>
    %cst_44 = arith.constant 1.26156676 : f32
    %152 = vector.broadcast %cst_44 : f32 to vector<8x128xf32>
    %153 = arith.mulf %151, %152 : vector<8x128xf32>
    %154 = arith.addf %148, %153 : vector<8x128xf32>
    %155 = arith.mulf %154, %34 : vector<8x128xf32>
    %cst_45 = arith.constant dense<0.000000e+00> : vector<8xf32>
    %156 = vector.multi_reduction <add>, %155, %cst_45 [1] : vector<8x128xf32> to vector<8xf32>
    %157 = vector.shape_cast %156 : vector<8xf32> to vector<8x1xf32>
    %c6_i32 = arith.constant 6 : i32
    %158 = vector.broadcast %c6_i32 : i32 to vector<8x128xi32>
    %159 = arith.cmpi eq, %50, %158 : vector<8x128xi32>
    %160 = vector.shape_cast %157 : vector<8x1xf32> to vector<8x1xf32>
    %161 = vector.broadcast %160 : vector<8x1xf32> to vector<8x128xf32>
    %162 = arith.select %159, %161, %146 : vector<8x128xi1>, vector<8x128xf32>
    %cst_46 = arith.constant dense<0.000000e+00> : vector<128xf32>
    %163 = vector.multi_reduction <add>, %162, %cst_46 [0] : vector<8x128xf32> to vector<128xf32>
    %164 = vector.shape_cast %163 : vector<128xf32> to vector<1x128xf32>
    %c0_i32_47 = arith.constant 0 : i32
    %165 = arith.cmpi eq, %arg1, %c0_i32_47 : i32
    %166 = arith.extui %165 : i1 to i32
    %c0_i32_48 = arith.constant 0 : i32
    %167 = arith.cmpi ne, %166, %c0_i32_48 : i32
    scf.if %167 {
      %c0_51 = arith.constant 0 : index
      %c0_52 = arith.constant 0 : index
      %c0_53 = arith.constant 0 : index
      %171 = vector.load %arg3[%c0_51, %c0_52, %c0_53] : memref<1x1x128xf32, #tpu.memory_space<vmem>>, vector<1x1x128xf32>
      %172 = vector.shape_cast %171 : vector<1x1x128xf32> to vector<1x128xf32>
      %173 = vector.shape_cast %164 : vector<1x128xf32> to vector<1x1x128xf32>
      tpu.vector_store %arg3[%c0_51, %c0_52, %c0_53], %173 {strides = array<i32>} : memref<1x1x128xf32, #tpu.memory_space<vmem>>, vector<1x1x128xf32>,
    } else {
    }
    %c0_i32_49 = arith.constant 0 : i32
    %168 = arith.cmpi sgt, %arg1, %c0_i32_49 : i32
    %169 = arith.extui %168 : i1 to i32
    %c0_i32_50 = arith.constant 0 : i32
    %170 = arith.cmpi ne, %169, %c0_i32_50 : i32
    scf.if %170 {
      %c0_51 = arith.constant 0 : index
      %c0_52 = arith.constant 0 : index
      %c0_53 = arith.constant 0 : index
      %171 = vector.load %arg3[%c0_51, %c0_52, %c0_53] : memref<1x1x128xf32, #tpu.memory_space<vmem>>, vector<1x1x128xf32>
      %172 = vector.shape_cast %171 : vector<1x1x128xf32> to vector<1x128xf32>
      %173 = arith.addf %172, %164 : vector<1x128xf32>
      %c0_54 = arith.constant 0 : index
      %c0_55 = arith.constant 0 : index
      %c0_56 = arith.constant 0 : index
      %174 = vector.load %arg3[%c0_54, %c0_55, %c0_56] : memref<1x1x128xf32, #tpu.memory_space<vmem>>, vector<1x1x128xf32>
      %175 = vector.shape_cast %174 : vector<1x1x128xf32> to vector<1x128xf32>
      %176 = vector.shape_cast %173 : vector<1x128xf32> to vector<1x1x128xf32>
      tpu.vector_store %arg3[%c0_54, %c0_55, %c0_56], %176 {strides = array<i32>} : memref<1x1x128xf32, #tpu.memory_space<vmem>>, vector<1x1x128xf32>,
    } else {
    }
    return
  }
  func.func @transform_0(%arg0: i32, %arg1: i32) -> (i32, i32, i32, i32, i32) {
    %c0_i32 = arith.constant 0 : i32
    %c0_i32_0 = arith.constant 0 : i32
    %c0_i32_1 = arith.constant 0 : i32
    %c0_i32_2 = arith.constant 0 : i32
    return %arg0, %arg1, %c0_i32, %c0_i32_0, %c0_i32_1 : i32, i32, i32, i32, i32
  }
  func.func @transform_1(%arg0: i32, %arg1: i32) -> (i32, i32, i32) {
    %c0_i32 = arith.constant 0 : i32
    %c0_i32_0 = arith.constant 0 : i32
    %c0_i32_1 = arith.constant 0 : i32
    return %arg0, %c0_i32, %c0_i32_0 : i32, i32, i32
  }
}

</mosaic_0001>

<bundles_post_ra>
// kernel: tpu_custom_call.1
= control target key start
LH: loop header
LB: loop body
LE: loop exit
PB: predicated region body
PF: predicated region fallthrough
CT: control target
= control target key end

     0   :  { %6 = vsyncpa [#allocation3], 0  ;;  %s515_s0 = inlined_call_operand.hbm [shape: f32[1,1,3,8,128], index: 0, kind: input, shape index: {}]   ;;  %s516_s1 = inlined_call_operand.hbm [shape: f32[1,1,128], index: 1, kind: output, shape index: {}]  }
   0x1   :  { %7 = vsyncpa [#allocation4], 0  ;;  %s12_s8 = sshll.u32 %s515_s0, 4  ;;  %s401_s9 = smov [#allocation2]   ;;  %s13_s8 = int_to_ptr.hbm [resolvable:$true] %s12_s8 }
   0x2   :  { %s14_s10 = sshll.u32 %s401_s9, 4  ;;  %s402_s11 = smov 128   ;;  %s15_s10 = int_to_ptr.vmem [resolvable:$true] %s14_s10 }
   0x3   :  { %s403_s12 = smov 8  }
   0x4   :  { %20 = dma.hbm_to_vmem [thread:$0]  %s13_s8, 384, %s15_s10, [#allocation3], %s402_s11, %s402_s11, %s403_s12  }
   0x5   :  { %397 = dma.done.wait [#allocation3], 384  }
   0x6   :  { %398 = vsyncadd [#allocation3], 4294966912  ;;  %v425_v0 = vld [vmem:[#allocation2] sm:$0xff]  ;;  %v427_v1 = vld [vmem:[#allocation2 + $0x8] sm:$0xff]  ;;  %v404_v30 = vmov 683565275  }
   0x7   :  { %v429_v2 = vld [vmem:[#allocation2 + $0x10] sm:$0xff]  ;;  %v30_v3 = vmul.f32 %v425_v0, %v425_v0  ;;  %v31_v4 = vmul.f32 %v427_v1, %v427_v1  ;;  %v405_v32 = vmov 2475754826   ;;  %v406_v34 = vmov 2131351028   ;;  %s411_s0 = smov [#allocation5]  }
   0x8   :  { %v33_v5 = vmul.f32 %v429_v2, %v429_v2  ;;  %v407_v36 = vmov 2102212464   ;;  %v408_v38 = vmov 920167782   ;;  %v409_v44 = vmov 1326507024  }
   0x9   :  { %v32_v6 = vadd.f32 %v31_v4, %v30_v3  ;;  %s319_s13 = sshll.u32 %s411_s0, 4  ;;  %s321_s16 = sshll.u32 %s516_s1, 4  ;;  %s320_s13 = int_to_ptr.vmem [resolvable:$true] %s319_s13  ;;  %s322_s16 = int_to_ptr.hbm [resolvable:$true] %s321_s16 }
   0xb   :  { %v34_v7 = vadd.f32 %v33_v5, %v32_v6 }
   0xd   :  { %345 = vrsqrt.f32 %v34_v7  ;;  %vm42_vm0 = vcmp.eq.f32.partialorder %v34_v7, inf  ;;  %v45_v14 = vand.u32 2147483648, %v34_v7  ;;  %vm44_vm1 = vcmp.eq.f32.partialorder %v34_v7, 0.0 }
  0x13   :  { %v346_v8 = vpop.eup %345 }
  0x14   :  { %v36_v9 = vmul.f32 %v346_v8, %v34_v7 }
  0x16   :  { %v37_v10 = vmul.f32 %v346_v8, %v36_v9 }
  0x18   :  { %v38_v11 = vmul.f32 0.5, %v37_v10 }
  0x1a   :  { %v39_v12 = vsub.f32 1.5, %v38_v11 }
  0x1c   :  { %v40_v13 = vmul.f32 %v346_v8, %v39_v12 }
  0x1e   :  { %v41_v15 = vmul.f32 %v40_v13, %v34_v7 }
  0x20   :  { %v43_v16 = vsel %vm42_vm0, %v34_v7, %v41_v15 }
  0x21   :  { %v437_v17 = vsel %vm44_vm1, %v45_v14, %v43_v16 }
  0x22   :  { %v440_v18 = vmul.f32 1.0471976, %v437_v17  ;;  %vm47_vm14 = vcmp.gt.f32.partialorder %v437_v17, 0.0 }
  0x24   :  { %v53_v19 = vand.u32 2139095040, %v440_v18  ;;  %v50_v21 = vand.u32 2147483647, %v440_v18  ;;  %vm52_vm15 = vcmp.lt.s32.totalorder %v440_v18, 0 }
  0x26   :  { %v54_v20 = vshrl.u32 %v53_v19, 23  ;;  %v57_v24 = vand.u32 8388607, %v50_v21  ;;  %vm488_vm0 = vcmp.le.f32.partialorder %v50_v21, 0.7853982 }
  0x28   :  { %v331_v22 = vadd.s32 4294967169, %v54_v20  ;;  %v58_v27 = vor.u32 8388608, %v57_v24  ;;  %v410_v24 = vmov 0  }
  0x2a   :  { %v60_v23 = vadd.s32 1, %v331_v22  ;;  %v449_v46 = vshll.u32 %v58_v27, 8 }
  0x2c   :  { %vm61_vm2 = vcmp.gt.s32.totalorder %v60_v23, 0  ;;  %v99_v58 = vand.u32 65535, %v449_v46  ;;  %v100_v59 = vshrl.u32 %v449_v46, 16 }
  0x2d   :  { %v62_v25 = vsel %vm61_vm2, %v60_v23, 0 }
  0x2e   :  { %v64_v26 = vand.u32 31, %v62_v25  ;;  %v446_v28 = vshrl.u32 %v62_v25, 5 }
  0x30   :  { %v65_v29 = vsub.s32 32, %v64_v26  ;;  %v67_v31 = vshll.u32 %v404_v30, %v64_v26  ;;  %v70_v33 = vshll.u32 %v405_v32, %v64_v26  ;;  %v73_v35 = vshll.u32 %v406_v34, %v64_v26 }
  0x31   :  { %v76_v37 = vshll.u32 %v407_v36, %v64_v26  ;;  %v79_v39 = vshll.u32 %v408_v38, %v64_v26  ;;  %vm82_vm3 = vcmp.lt.s32.totalorder %v446_v28, 1  ;;  %vm85_vm4 = vcmp.lt.s32.totalorder %v446_v28, 4 }
  0x32   :  { %v68_v40 = vshrl.u32 %v405_v32, %v65_v29  ;;  %v71_v41 = vshrl.u32 %v406_v34, %v65_v29  ;;  %v74_v42 = vshrl.u32 %v407_v36, %v65_v29  ;;  %v77_v43 = vshrl.u32 %v408_v38, %v65_v29 }
  0x33   :  { %v80_v45 = vshrl.u32 %v409_v44, %v65_v29  ;;  %vm84_vm5 = vcmp.lt.s32.totalorder %v446_v28, 3  ;;  %vm83_vm6 = vcmp.lt.s32.totalorder %v446_v28, 2  ;;  %v66_v5 = vshrl.u32 %v404_v30, %v65_v29 }
  0x34   :  { %v69_v47 = vor.u32 %v68_v40, %v67_v31  ;;  %v72_v48 = vor.u32 %v71_v41, %v70_v33  ;;  %v75_v49 = vor.u32 %v74_v42, %v73_v35  ;;  %v78_v50 = vor.u32 %v77_v43, %v76_v37 }
  0x35   :  { %v81_v51 = vor.u32 %v80_v45, %v79_v39 }
  0x36   :  { %v90_v52 = vsel %vm82_vm3, %v69_v47, %v72_v48  ;;  %v94_v53 = vsel %vm82_vm3, %v72_v48, %v75_v49  ;;  %v91_v54 = vsel %vm85_vm4, %v78_v50, 920167782  ;;  %v86_v20 = vsel %vm82_vm3, %v66_v5, %v69_v47 }
  0x37   :  { %v95_v55 = vsel %vm85_vm4, %v81_v51, 1326507024  ;;  %v92_v56 = vsel %vm84_vm5, %v75_v49, %v91_v54  ;;  %v87_v23 = vsel %vm85_vm4, %v75_v49, 2102212464 }
  0x38   :  { %v96_v57 = vsel %vm84_vm5, %v78_v50, %v95_v55  ;;  %v93_v60 = vsel %vm83_vm6, %v90_v52, %v92_v56  ;;  %v88_v34 = vsel %vm84_vm5, %v72_v48, %v87_v23 }
  0x39   :  { %v97_v61 = vsel %vm83_vm6, %v94_v53, %v96_v57  ;;  %v123_v3 = vand.u32 65535, %v93_v60  ;;  %v124_v4 = vshrl.u32 %v93_v60, 16  ;;  %v89_v42 = vsel %vm83_vm6, %v86_v20, %v88_v34 }
  0x3a   :  { %v101_v62 = vand.u32 65535, %v97_v61  ;;  %v102_v63 = vshrl.u32 %v97_v61, 16  ;;  %v143_v47 = vmul.u32 %v449_v46, %v89_v42 }
  0x3b   :  { %v125_v9 = vmul.u32 %v123_v3, %v99_v58  ;;  %v126_v10 = vmul.u32 %v124_v4, %v99_v58  ;;  %v127_v11 = vmul.u32 %v123_v3, %v100_v59  ;;  %v128_v15 = vmul.u32 %v124_v4, %v100_v59 }
  0x3c   :  { %v103_v6 = vmul.u32 %v101_v62, %v99_v58  ;;  %v104_v7 = vmul.u32 %v102_v63, %v99_v58  ;;  %v105_v8 = vmul.u32 %v101_v62, %v100_v59  ;;  %v106_v12 = vmul.u32 %v102_v63, %v100_v59 }
  0x3d   :  { %v129_v16 = vshll.u32 %v126_v10, 16  ;;  %v131_v19 = vshll.u32 %v127_v11, 16  ;;  %v130_v32 = vshrl.u32 %v126_v10, 16  ;;  %v132_v38 = vshrl.u32 %v127_v11, 16 }
  0x3e   :  { %v107_v13 = vshll.u32 %v104_v7, 16  ;;  %v109_v14 = vshll.u32 %v105_v8, 16  ;;  %v108_v27 = vshrl.u32 %v104_v7, 16  ;;  %v110_v35 = vshrl.u32 %v105_v8, 16 }
  0x3f   :  { %vm133_vm8 = vc.u32 %v125_v9, %v129_v16  ;;  %v135_v26 = vadd.s32 %v129_v16, %v125_v9  ;;  %v48_v7 = vsel %vm47_vm14, %v437_v17, 1.0 }
  0x40   :  { %vm111_vm7 = vc.u32 %v103_v6, %v107_v13  ;;  %v113_v22 = vadd.s32 %v107_v13, %v103_v6  ;;  %v134_v30 = vsel %vm133_vm8, 1, %v410_v24  ;;  %347 = vrcp.f32 %v48_v7 }
  0x41   :  { %v112_v25 = vsel %vm111_vm7, 1, %v410_v24  ;;  %v136_v33 = vadd.s32 %v134_v30, %v128_v15  ;;  %vm137_vm10 = vc.u32 %v135_v26, %v131_v19  ;;  %v139_v41 = vadd.s32 %v135_v26, %v131_v19 }
  0x42   :  { %v114_v29 = vadd.s32 %v112_v25, %v106_v12  ;;  %vm115_vm9 = vc.u32 %v113_v22, %v109_v14  ;;  %v138_v37 = vsel %vm137_vm10, 1, %v410_v24  ;;  %vm214_vm2 = vweird.f32 %v48_v7 }
  0x43   :  { %v116_v31 = vsel %vm115_vm9, 1, %v410_v24  ;;  %v140_v39 = vadd.s32 %v138_v37, %v136_v33  ;;  %v230_v33 = vmul.f32 -0.5, %v427_v1  ;;  %vm193_vm7 = vweird.f32 %v440_v18 }
  0x44   :  { %v118_v36 = vadd.s32 %v116_v31, %v114_v29  ;;  %vm206_vm8 = vcmp.le.f32.partialorder %v437_v17, 3.0 }
  0x45   :  { %v141_v43 = vadd.s32 %v140_v39, %v130_v32  ;;  %v229_v32 = vmul.f32 -0.5, %v425_v0  ;;  %v220_v0 = vand.u32 2147483648, %v48_v7  ;;  %vm207_vm10 = vmand %vm47_vm14, %vm206_vm8 }
  0x46   :  { %v119_v40 = vadd.s32 %v118_v36, %v108_v27  ;;  %v348_v15 = vpop.eup %347 }
  0x47   :  { %v142_v45 = vadd.s32 %v141_v43, %v132_v38  ;;  %v210_v23 = vmul.f32 %v348_v15, %v48_v7  ;;  %vm215_vm3 = vweird.f32 %v348_v15 }
  0x48   :  { %v120_v44 = vadd.s32 %v119_v40, %v110_v35  ;;  %v231_v40 = vmul.f32 %v229_v32, %v229_v32  ;;  %vm499_vm6 = vmor %vm214_vm2, %vm215_vm3 }
  0x49   :  { %v146_v49 = vadd.s32 1, %v142_v45  ;;  %v211_v29 = vsub.f32 1.0, %v210_v23 }
  0x4a   :  { %vm145_vm11 = vc.u32 %v120_v44, %v139_v41  ;;  %v144_v28 = vadd.s32 %v139_v41, %v120_v44  ;;  %v232_v41 = vmul.f32 %v230_v33, %v230_v33 }
  0x4b   :  { %v147_v50 = vsel %vm145_vm11, %v146_v49, %v142_v45  ;;  %v212_v37 = vmul.f32 %v348_v15, %v211_v29  ;;  %v218_v45 = vand.u32 2147483647, %v48_v7 }
  0x4c   :  { %v148_v51 = vadd.s32 %v147_v50, %v143_v47  ;;  %v233_v50 = vsub.f32 %v231_v40, %v232_v41 }
  0x4d   :  { %v213_v44 = vadd.f32 %v348_v15, %v212_v37  ;;  %vm219_vm9 = vcmp.eq.f32.partialorder %v218_v45, 8.507059e+37 }
  0x4e   :  { %v149_v48 = vadd.s32 536870912, %v148_v51  ;;  %v262_v10 = vmul.f32 %v233_v50, %v233_v50 }
  0x50   :  { %v150_v52 = vshrl.u32 %v149_v48, 30 }
  0x52   :  { %v151_v53 = vshll.u32 %v150_v52, 30  ;;  %v174_v13 = vsub.s32 4, %v150_v52 }
  0x54   :  { %v152_v54 = vsub.s32 %v148_v51, %v151_v53  ;;  %v175_v22 = vsel %vm52_vm15, %v174_v13, %v150_v52  ;;  %v234_v51 = vmul.f32 2.0, %v229_v32  ;;  %v217_v53 = vsel %vm499_vm6, %v348_v15, %v213_v44 }
  0x55   :  { %v177_v21 = vsel %vm488_vm0, 0, %v175_v22  ;;  %v265_v13 = vmul.f32 2.1850977, %v262_v10 }
  0x56   :  { %vm153_vm12 = vcmp.lt.s32.totalorder %v152_v54, 0  ;;  %v154_v55 = vsub.s32 0, %v152_v54  ;;  %v194_v34 = vand.u32 3, %v177_v21 }
  0x58   :  { %v155_v56 = vsel %vm153_vm12, %v154_v55, %v152_v54  ;;  %vm199_vm1 = vcmp.eq.s32.totalorder %v194_v34, 2  ;;  %vm195_vm4 = vcmp.lt.s32.totalorder %v194_v34, 2  ;;  %vm196_vm5 = vcmp.eq.s32.totalorder %v194_v34, 0 }
  0x59   :  { %v156_v57 = vclz %v155_v56  ;;  %v235_v56 = vmul.f32 %v234_v51, %v230_v33 }
  0x5b   :  { %v332_v58 = vadd.s32 4294967294, %v156_v57  ;;  %v263_v57 = vmul.f32 0.0, %v233_v50 }
  0x5d   :  { %vm333_vm13 = vcmp.lt.s32.totalorder %v332_v58, 0 }
  0x5e   :  { %v159_v59 = vsel %vm333_vm13, 0, %v332_v58 }
  0x5f   :  { %v160_v60 = vsub.s32 32, %v159_v59  ;;  %v161_v61 = vshll.u32 %v152_v54, %v159_v59  ;;  %v164_v62 = vsub.s32 4294967266, %v159_v59  ;;  %v221_v54 = vor.u32 1.1754944e-38, %v220_v0 }
  0x61   :  { %v162_v46 = vshrl.u32 %v144_v28, %v160_v60  ;;  %v165_v63 = vadd.s32 127, %v164_v62  ;;  %v243_v28 = vmul.f32 0.0, %v229_v32  ;;  %v222_v60 = vsel %vm219_vm9, %v221_v54, %v217_v53 }
  0x63   :  { %v163_v3 = vor.u32 %v162_v46, %v161_v61  ;;  %v166_v4 = vshll.u32 %v165_v63, 23  ;;  %v245_v63 = vmul.f32 -0.97720546, %v231_v40 }
  0x65   :  { %v167_v5 = vor.u32 4788187, %v166_v4  ;;  %v170_v6 = vcvt.s32.f32 %v163_v3  ;;  %v244_v3 = vadd.f32 %v243_v28, %v230_v33 }
  0x67   :  { %v168_v8 = vand.u32 2147483647, %v167_v5 }
  0x69   :  { %v171_v9 = vmul.f32 %v170_v6, %v168_v8 }
  0x6b   :  { %v172_v11 = vxor.u32 2147483648, %v171_v9 }
  0x6d   :  { %v173_v12 = vsel %vm52_vm15, %v172_v11, %v171_v9  ;;  %v246_v9 = vmul.f32 -0.97720546, %v244_v3 }
  0x6e   :  { %v176_v14 = vsel %vm488_vm0, %v440_v18, %v173_v12  ;;  %v264_v18 = vadd.f32 %v263_v57, %v235_v56 }
  0x6f   :  { %v178_v16 = vmul.f32 %v176_v14, %v176_v14 }
  0x70   :  { %v266_v7 = vmul.f32 2.1850977, %v264_v18 }
  0x71   :  { %v179_v19 = vmul.f32 -0.001358992, %v178_v16  ;;  %v186_v20 = vmul.f32 -0.00019511016, %v178_v16 }
  0x73   :  { %v180_v24 = vadd.f32 0.041655596, %v179_v19  ;;  %v187_v25 = vadd.f32 0.008332121, %v186_v20  ;;  %v289_v19 = vmul.f32 1.2615668, %v233_v50 }
  0x74   :  { %v277_v20 = vmul.f32 -2.1850977, %v231_v40 }
  0x75   :  { %v181_v26 = vmul.f32 %v180_v24, %v178_v16  ;;  %v188_v27 = vmul.f32 %v187_v25, %v178_v16  ;;  %v290_v23 = vadd.f32 0.6307834, %v289_v19  ;;  %v236_v25 = vlaneseq }
  0x77   :  { %v182_v30 = vadd.f32 -0.4999988, %v181_v26  ;;  %v189_v31 = vadd.f32 -0.16666654, %v188_v27  ;;  %v237_v26 = vand.u32 127, %v236_v25 }
  0x79   :  { %v183_v35 = vmul.f32 %v182_v30, %v178_v16  ;;  %v190_v36 = vmul.f32 %v189_v31, %v178_v16  ;;  %v278_v16 = vmul.f32 -2.1850977, %v244_v3  ;;  %vm241_vm11 = vcmp.eq.s32.totalorder %v237_v26, 0 }
  0x7a   :  { %vm251_vm12 = vcmp.eq.s32.totalorder %v237_v26, 1  ;;  %vm255_vm13 = vcmp.eq.s32.totalorder %v237_v26, 3  ;;  %vm260_vm14 = vcmp.eq.s32.totalorder %v237_v26, 2  ;;  %vm271_vm15 = vcmp.eq.s32.totalorder %v237_v26, 4 }
  0x7b   :  { %v184_v38 = vadd.f32 1.0, %v183_v35  ;;  %v191_v39 = vadd.f32 1.0, %v190_v36  ;;  %vm275_vm0 = vcmp.eq.s32.totalorder %v237_v26, 8  ;;  %vm287_vm2 = vcmp.eq.s32.totalorder %v237_v26, 7 }
  0x7c   :  { %vm294_vm3 = vcmp.eq.s32.totalorder %v237_v26, 6 }
  0x7d   :  { %v192_v42 = vmul.f32 %v191_v39, %v176_v14  ;;  %v200_v43 = vxor.u32 2147483648, %v184_v38 }
  0x7f   :  { %v197_v47 = vxor.u32 2147483648, %v192_v42  ;;  %v201_v1 = vsel %vm199_vm1, %v200_v43, %v192_v42  ;;  %vm283_vm1 = vcmp.eq.s32.totalorder %v237_v26, 5 }
  0x81   :  { %v198_v48 = vsel %vm196_vm5, %v184_v38, %v197_v47 }
  0x82   :  { %v202_v52 = vsel %vm195_vm4, %v198_v48, %v201_v1 }
  0x83   :  { %v203_v55 = vsel %vm193_vm7, nan, %v202_v52 }
  0x84   :  { %v204_v58 = vadd.f32 1.0, %v203_v55 }
  0x86   :  { %v205_v59 = vmul.f32 0.5, %v204_v58 }
  0x88   :  { %v208_v61 = vsel %vm207_vm10, %v205_v59, 0.0 }
  0x89   :  { %v226_v62 = vmul.f32 %v208_v61, %v429_v2  ;;  %v224_v46 = vmul.f32 %v222_v60, %v208_v61 }
  0x8b   :  { %v238_v4 = vmul.f32 0.28209493, %v226_v62  ;;  %v225_v5 = vmul.f32 %v224_v46, %v222_v60  ;;  %v227_v6 = vmul.f32 %v224_v46, %v429_v2 }
  0x8d   :  { %239 = vadd.xlane.f32.xlu0 %v238_v4  ;;  %v228_v8 = vmul.f32 %v225_v5, %v429_v2  ;;  %v247_v17 = vmul.f32 %v245_v63, %v227_v6  ;;  %v248_v12 = vmul.f32 %v246_v9, %v227_v6  ;;  %v257_v14 = vmul.f32 0.48860273, %v227_v6 }
  0x8f   :  { %253 = vadd.xlane.f32.xlu1 %v247_v17  ;;  %v268_v11 = vmul.f32 %v266_v7, %v228_v8  ;;  %v267_v15 = vmul.f32 %v265_v13, %v228_v8  ;;  %v280_v22 = vmul.f32 %v278_v16, %v228_v8  ;;  %v279_v24 = vmul.f32 %v277_v20, %v228_v8 }
  0x90   :  { %v291_v2 = vmul.f32 %v290_v23, %v228_v8 }
  0x91   :  { %269 = vadd.xlane.f32.xlu2 %v268_v11 }
  0x95   :  { %249 = vadd.xlane.f32.xlu0 %v248_v12 }
  0x97   :  { %258 = vadd.xlane.f32.xlu1 %v257_v14 }
  0x99   :  { %273 = vadd.xlane.f32.xlu2 %v267_v15 }
  0x9d   :  { %281 = vadd.xlane.f32.xlu0 %v280_v22 }
  0x9f   :  { %285 = vadd.xlane.f32.xlu1 %v279_v24 }
  0xa1   :  { %292 = vadd.xlane.f32.xlu2 %v291_v2 }
 0x100   :  { %v240_v21 = vpop.xlane.xlu0 %239 }
 0x101   :  { %v242_v30 = vsel %vm241_vm11, %v240_v21, 0.0 }
 0x102   :  { %v254_v27 = vpop.xlane.xlu1 %253 }
 0x104   :  { %v270_v29 = vpop.xlane.xlu2 %269 }
 0x108   :  { %v250_v31 = vpop.xlane.xlu0 %249 }
 0x109   :  { %v252_v32 = vsel %vm251_vm12, %v250_v31, %v242_v30 }
 0x10a   :  { %v256_v33 = vsel %vm255_vm13, %v254_v27, %v252_v32  ;;  %v259_v34 = vpop.xlane.xlu1 %258 }
 0x10b   :  { %v261_v35 = vsel %vm260_vm14, %v259_v34, %v256_v33 }
 0x10c   :  { %v274_v36 = vpop.xlane.xlu2 %273  ;;  %v272_v37 = vsel %vm271_vm15, %v270_v29, %v261_v35 }
 0x10d   :  { %v276_v38 = vsel %vm275_vm0, %v274_v36, %v272_v37 }
 0x110   :  { %v282_v39 = vpop.xlane.xlu0 %281 }
 0x111   :  { %v284_v40 = vsel %vm283_vm1, %v282_v39, %v276_v38 }
 0x112   :  { %v286_v41 = vpop.xlane.xlu1 %285 }
 0x113   :  { %v288_v42 = vsel %vm287_vm2, %v286_v41, %v284_v40 }
 0x114   :  { %v293_v43 = vpop.xlane.xlu2 %292 }
 0x115   :  { %v295_v44 = vsel %vm294_vm3, %v293_v43, %v288_v42 }
 0x116   :  { %v296_v45 = vrot.slane %v295_v44, 4 }
 0x118   :  { %v297_v0 = vadd.f32 %v296_v45, %v295_v44 }
 0x11a   :  { %v298_v47 = vrot.slane %v297_v0, 2 }
 0x11c   :  { %v299_v1 = vadd.f32 %v298_v47, %v297_v0 }
 0x11e   :  { %v300_v49 = vrot.slane %v299_v1, 1 }
 0x120   :  { %v301_v50 = vadd.f32 %v300_v49, %v299_v1 }
 0x122   :  { %306 = vst [vmem:[#allocation5] sm:$0x1] %v301_v50 }
 0x123   :  { %324 = dma.vmem_to_hbm [thread:$0]  %s320_s13, 16, %s322_s16, [#allocation4]  }
 0x124   :  { %399 = dma.done.wait [#allocation4], 16  }
 0x125   :  { %400 = vsyncadd [#allocation4], 4294967280 }
 0x126   :  { %329 = vsyncpa [#allocation3], 1 }
 0x127   :  { %330 = vsyncpa [#allocation4], 1 }

</bundles_post_ra>
